<compile_context>
chip_gen: v6e
topology: v6e:2x2x1
jax: 0.10.0
libtpu: 0.0.40
codegen_flags: <defaults>
</compile_context>

<pallas_src>
import functools

import jax
import jax.numpy as jnp
from jax.experimental import pallas as pl
from jax.experimental.pallas import tpu as pltpu


def _round_up(n: int, m: int) -> int:
    return ((n + m - 1) // m) * m


def _vmem_limit_bytes() -> int:
    """Per-generation scoped-VMEM limit with headroom.

    v5e/v6e: 128 MiB physical -> ~96 MiB budget; v7x: 64 MiB -> ~48 MiB.
    """
    try:
        cap = int(pltpu.get_tpu_info().vmem_capacity_bytes)
    except Exception:
        cap = 64 * 1024 * 1024
    return max(32 * 1024 * 1024, min((cap * 3) // 4, 100 * 1024 * 1024))


def _choose_tk(dp: int, colw: int, itemsize: int, budget: int) -> int:
    """Largest prec row tile (any multiple of 128 that divides dp) whose
    double-buffered (tk, colw) tile fits `budget` bytes."""
    for tk in range(dp, 0, -128):          # dp is a multiple of 128
        if dp % tk:
            continue
        if 2 * tk * colw * itemsize <= budget:
            return tk
    return 128


def _mahalanobis_kernel(diff_ref, diffc_ref, prec_ref, o_ref, *,
                        tk, sub_tb, num_sub):
    """Grid = (column_blocks, k_blocks); axis 1 tiles the rows of prec.

    diff_ref  : (rows, dp)   f32, resident across the whole grid (fetched once)
    diffc_ref : (rows, colw) f32, this column block of diff (re-fetched only
                when the column block changes, i.e. <= num_col_blocks times)
    prec_ref  : (tk, colw)   streamed prec tile (rows k*tk:., cols of block c)
    o_ref     : (rows, 1)    f32 partial result, resident across k (accumulator)
    """
    k = pl.program_id(1)
    dp = diff_ref.shape[1]

    @pl.when(k == 0)
    def _init():
        o_ref[...] = jnp.zeros_like(o_ref)

    # prec is streamed narrow (bf16 by default) but upcast right after the
    # DMA, so the MXU matmul and the accumulation stay float32.
    prec_blk = prec_ref[...].astype(jnp.float32)                 # (tk, colw)

    for b in range(num_sub):          # static loop over batch sub-blocks
        b0 = b * sub_tb
        if tk == dp:
            # Single k step: static (free) slice of the resident diff block.
            diff_seg = diff_ref[pl.ds(b0, sub_tb), :]            # (sub_tb, tk)
        else:
            # Lane-aligned dynamic window into the resident diff block
            # (tk is a multiple of 128 so the slice is vreg-aligned).
            k0 = pl.multiple_of(k * tk, 128)
            diff_seg = diff_ref[pl.ds(b0, sub_tb), pl.ds(k0, tk)]
        diff_col = diffc_ref[pl.ds(b0, sub_tb), :]               # (sub_tb, colw)

        # Partial of v = diff @ prec contributed by this prec row tile (MXU),
        # folded straight into a per-row scalar for this column block.
        v = jnp.dot(diff_seg, prec_blk,
                    preferred_element_type=jnp.float32)          # (sub_tb, colw)
        o_ref[pl.ds(b0, sub_tb), :] += jnp.sum(v * diff_col, axis=-1,
                                               keepdims=True)


def _pallas_mahalanobis(diff_chunk, prec_p, *, ncol, colw, tk, sub_tb,
                        vmem_limit):
    rows, dp = diff_chunk.shape
    num_k = dp // tk
    num_sub = rows // sub_tb

    kernel = functools.partial(_mahalanobis_kernel,
                               tk=tk, sub_tb=sub_tb, num_sub=num_sub)

    out = pl.pallas_call(
        kernel,
        out_shape=jax.ShapeDtypeStruct((ncol, rows, 1), jnp.float32),
        grid_spec=pltpu.PrefetchScalarGridSpec(
            num_scalar_prefetch=0,
            grid=(ncol, num_k),
            in_specs=[
                # diff, fully resident across the whole grid (fetched once).
                pl.BlockSpec((rows, dp), lambda c, k: (0, 0)),
                # diff column window for this core's column block (re-fetched
                # only when c changes, never per k step).
                pl.BlockSpec((rows, colw), lambda c, k: (0, c)),
                # prec row tile of this column block (double-buffered stream;
                # a pl.Buffered(3) sweep is a possible further tweak).
                pl.BlockSpec((tk, colw), lambda c, k: (k, c)),
            ],
            out_specs=pl.BlockSpec((None, rows, 1), lambda c, k: (c, 0, 0)),
        ),
        compiler_params=pltpu.CompilerParams(
            dimension_semantics=("parallel", "arbitrary"),
            vmem_limit_bytes=vmem_limit,
        ),
    )(diff_chunk, diff_chunk, prec_p)

    # Sum the per-column-block partials -> (rows,)
    return jnp.sum(out[:, :, 0], axis=0)


def mahalanobis_distance_batched(x, y, prec, *, prec_dtype=jnp.bfloat16,
                                 num_col_blocks=1):
    """Squared Mahalanobis distances for a batch of pairs sharing one `prec`.

    x, y : [B, D], prec : [D, D]  ->  [B] float32.

    `prec` is streamed in `prec_dtype` (bf16 by default: halves HBM bytes; the
    matmul and accumulation stay f32).  Pass prec_dtype=jnp.float32 for exact
    f32 module semantics.  `num_col_blocks=2` splits prec's columns across the
    two TensorCores on v7x (exact split; also correct on 1-TC chips).
    """
    x = jnp.asarray(x)
    y = jnp.asarray(y)
    prec = jnp.asarray(prec)
    assert x.ndim == 2 and y.shape == x.shape, (x.shape, y.shape)
    b, d = x.shape
    assert prec.shape == (d, d), prec.shape
    ncol = int(num_col_blocks)
    assert ncol >= 1

    prec_dtype = jnp.dtype(prec_dtype)
    dp = _round_up(max(d, 1), 128 * ncol)
    colw = dp // ncol

    vmem_limit = _vmem_limit_bytes()

    # Batch sub-block used inside the kernel (keeps the (sub_tb, colw) f32
    # matmul output small).
    max_sub = max(8, min(256, ((4 << 20) // (colw * 4)) // 8 * 8))
    bp = _round_up(max(b, 1), 8)
    if bp > max_sub:
        sub_tb = max(s for s in (256, 128, 64, 32, 16, 8) if s <= max_sub)
        bp = _round_up(bp, sub_tb)
    else:
        sub_tb = bp

    # Keep the resident diff (+ its column-window copy) at <= ~35% of the VMEM
    # budget; larger batches are processed in row chunks (prec is re-streamed
    # once per chunk, which is unavoidable once diff no longer fits VMEM).
    per_row_bytes = 2 * dp * 4 + 2 * colw * 4      # conservatively double-buffered
    max_rows = max(sub_tb,
                   ((vmem_limit * 35 // 100) // per_row_bytes) // sub_tb * sub_tb)
    chunk_rows = min(bp, max_rows)

    prec_budget = vmem_limit - chunk_rows * per_row_bytes - (8 << 20)
    prec_budget = max(prec_budget, 2 * 128 * colw * prec_dtype.itemsize)
    tk = _choose_tk(dp, colw, prec_dtype.itemsize, prec_budget)

    # Zero-pad to aligned shapes: padded diff lanes and prec rows/cols are
    # zero, so they contribute nothing to the reduction (exact).
    diff = x.astype(jnp.float32) - y.astype(jnp.float32)
    diff_p = jnp.zeros((bp, dp), jnp.float32).at[:b, :d].set(diff)
    prec_p = jnp.zeros((dp, dp), prec_dtype).at[:d, :d].set(
        prec.astype(prec_dtype))

    outs = []
    for r0 in range(0, bp, chunk_rows):
        rows = min(chunk_rows, bp - r0)            # always a multiple of sub_tb
        outs.append(_pallas_mahalanobis(
            diff_p[r0:r0 + rows], prec_p,
            ncol=ncol, colw=colw, tk=tk, sub_tb=sub_tb, vmem_limit=vmem_limit))
    out = outs[0] if len(outs) == 1 else jnp.concatenate(outs, axis=0)
    return out[:b]


def mahalanobis_distance(x, y, prec, *, prec_dtype=jnp.bfloat16,
                         num_col_blocks=1):
    """PyTorch `MahalanobisDistance.forward`: diff = x - y; diff @ prec @ diff.

    Use prec_dtype=jnp.float32 for exact float32 semantics (default streams
    prec as bf16 with f32 compute).
    """
    x = jnp.asarray(x)
    y = jnp.asarray(y)
    assert x.ndim == 1 and y.shape == x.shape, (x.shape, y.shape)
    out = mahalanobis_distance_batched(x[None, :], y[None, :], prec,
                                       prec_dtype=prec_dtype,
                                       num_col_blocks=num_col_blocks)
    return out[0]


if __name__ == "__main__":
    key = jax.random.PRNGKey(0)
    kx, ky, kp, kbx, kby = jax.random.split(key, 5)

    D = 300   # not a multiple of 128 -> exercises zero-padding
    B = 5     # batched pairs sharing the same precision matrix

    x = jax.random.normal(kx, (D,), dtype=jnp.float32)
    y = jax.random.normal(ky, (D,), dtype=jnp.float32)
    a = jax.random.normal(kp, (D, D), dtype=jnp.float32) * 0.1
    prec = a @ a.T + jnp.eye(D, dtype=jnp.float32)   # symmetric positive-definite

    diff = x - y
    ref = jnp.einsum("i,ij,j->", diff, prec, diff,
                     precision=jax.lax.Precision.HIGHEST)

    # --- exact f32 path (PyTorch module semantics) --------------------------
    dist_f32 = jax.block_until_ready(
        mahalanobis_distance(x, y, prec, prec_dtype=jnp.float32))
    assert jnp.allclose(dist_f32, ref, rtol=1e-4, atol=1e-3), (dist_f32, ref)

    # --- default path: bf16-streamed prec, f32 compute -----------------------
    dist = jax.block_until_ready(mahalanobis_distance(x, y, prec))
    assert jnp.allclose(dist, ref, rtol=2e-2, atol=1e-1), (dist, ref)

    # --- batched pairs sharing prec (prec streamed once per call) -----------
    xb = jax.random.normal(kbx, (B, D), dtype=jnp.float32)
    yb = jax.random.normal(kby, (B, D), dtype=jnp.float32)
    diffb = xb - yb
    refb = jnp.einsum("bi,ij,bj->b", diffb, prec, diffb,
                      precision=jax.lax.Precision.HIGHEST)

    dists_f32 = jax.block_until_ready(
        mahalanobis_distance_batched(xb, yb, prec, prec_dtype=jnp.float32))
    assert jnp.allclose(dists_f32, refb, rtol=1e-4, atol=1e-3), (dists_f32, refb)

    dists = jax.block_until_ready(mahalanobis_distance_batched(xb, yb, prec))
    assert jnp.allclose(dists, refb, rtol=2e-2, atol=1e-1), (dists, refb)

    # --- prec-column split across TensorCores (v7x megacore; exact) ---------
    dists_2tc = jax.block_until_ready(
        mahalanobis_distance_batched(xb, yb, prec, prec_dtype=jnp.float32,
                                     num_col_blocks=2))
    assert jnp.allclose(dists_2tc, refb, rtol=1e-4, atol=1e-3), (dists_2tc, refb)

    print("KERNEL_OK")
</pallas_src>

<mosaic_0001>
module attributes {stable_mosaic.version = 11 : i64} {
  func.func @_mahalanobis_kernel(%arg0: i32, %arg1: i32, %arg2: memref<8x384xf32, #tpu.memory_space<vmem>>, %arg3: memref<8x384xf32, #tpu.memory_space<vmem>>, %arg4: memref<384x384xf32, #tpu.memory_space<vmem>>, %arg5: memref<1x8x1xf32, #tpu.memory_space<vmem>>) attributes {dimension_semantics = [#tpu.dimension_semantics<parallel>, #tpu.dimension_semantics<arbitrary>], iteration_bounds = array<i64: 1, 1>, scalar_prefetch = 0 : i64, scratch_operands = 0 : i64, tpu.core_type = #tpu.core_type<tc>, window_params = [{pipeline_mode = #tpu.pipeline_mode<synchronous>, transform_indices = @transform_0, window_bounds = array<i64: 8, 384>}, {transform_indices = @transform_1, window_bounds = array<i64: 8, 384>}, {transform_indices = @transform_2, window_bounds = array<i64: 384, 384>}, {transform_indices = @transform_3, window_bounds = array<i64: 1, 8, 1>}]} {
    %c0_i32 = arith.constant 0 : i32
    %0 = arith.cmpi eq, %arg1, %c0_i32 : i32
    %1 = arith.extui %0 : i1 to i32
    %c0_i32_0 = arith.constant 0 : i32
    %2 = arith.cmpi ne, %1, %c0_i32_0 : i32
    scf.if %2 {
      %cst_13 = arith.constant 0.000000e+00 : f32
      %16 = vector.broadcast %cst_13 : f32 to vector<8x1xf32>
      %c0_14 = arith.constant 0 : index
      %c0_15 = arith.constant 0 : index
      %c0_16 = arith.constant 0 : index
      %17 = vector.load %arg5[%c0_14, %c0_15, %c0_16] : memref<1x8x1xf32, #tpu.memory_space<vmem>>, vector<1x8x1xf32>
      %18 = vector.shape_cast %17 : vector<1x8x1xf32> to vector<8x1xf32>
      %19 = vector.shape_cast %16 : vector<8x1xf32> to vector<1x8x1xf32>
      tpu.vector_store %arg5[%c0_14, %c0_15, %c0_16], %19 {strides = array<i32>} : memref<1x8x1xf32, #tpu.memory_space<vmem>>, vector<1x8x1xf32>,
    } else {
    }
    %c0 = arith.constant 0 : index
    %c0_1 = arith.constant 0 : index
    %3 = vector.load %arg4[%c0, %c0_1] : memref<384x384xf32, #tpu.memory_space<vmem>>, vector<384x384xf32>
    %c0_2 = arith.constant 0 : index
    %c0_3 = arith.constant 0 : index
    %4 = vector.load %arg2[%c0_2, %c0_3] : memref<8x384xf32, #tpu.memory_space<vmem>>, vector<8x384xf32>
    %c0_4 = arith.constant 0 : index
    %c0_5 = arith.constant 0 : index
    %5 = vector.load %arg3[%c0_4, %c0_5] : memref<8x384xf32, #tpu.memory_space<vmem>>, vector<8x384xf32>
    %cst = arith.constant dense<0.000000e+00> : vector<8x384xf32>
    %6 = tpu.matmul %4, %3, %cst {dimension_numbers = #tpu.dot_dimension_numbers<[1], [0], [0], [1], [0, 0, 1, 1], [], []>} : vector<8x384xf32>, vector<384x384xf32>, vector<8x384xf32> -> vector<8x384xf32>
    %c0_6 = arith.constant 0 : index
    %c0_7 = arith.constant 0 : index
    %c0_8 = arith.constant 0 : index
    %7 = vector.load %arg5[%c0_6, %c0_7, %c0_8] : memref<1x8x1xf32, #tpu.memory_space<vmem>>, vector<1x8x1xf32>
    %8 = vector.shape_cast %7 : vector<1x8x1xf32> to vector<8x1xf32>
    %9 = arith.mulf %6, %5 : vector<8x384xf32>
    %cst_9 = arith.constant dense<0.000000e+00> : vector<8xf32>
    %10 = vector.multi_reduction <add>, %9, %cst_9 [1] : vector<8x384xf32> to vector<8xf32>
    %11 = vector.shape_cast %10 : vector<8xf32> to vector<8x1xf32>
    %12 = arith.addf %8, %11 : vector<8x1xf32>
    %c0_10 = arith.constant 0 : index
    %c0_11 = arith.constant 0 : index
    %c0_12 = arith.constant 0 : index
    %13 = vector.load %arg5[%c0_10, %c0_11, %c0_12] : memref<1x8x1xf32, #tpu.memory_space<vmem>>, vector<1x8x1xf32>
    %14 = vector.shape_cast %13 : vector<1x8x1xf32> to vector<8x1xf32>
    %15 = vector.shape_cast %12 : vector<8x1xf32> to vector<1x8x1xf32>
    tpu.vector_store %arg5[%c0_10, %c0_11, %c0_12], %15 {strides = array<i32>} : memref<1x8x1xf32, #tpu.memory_space<vmem>>, vector<1x8x1xf32>,
    return
  }
  func.func @transform_0(%arg0: i32, %arg1: i32) -> (i32, i32) {
    %c0_i32 = arith.constant 0 : i32
    %c0_i32_0 = arith.constant 0 : i32
    %c0_i32_1 = arith.constant 0 : i32
    return %c0_i32, %c0_i32_0 : i32, i32
  }
  func.func @transform_1(%arg0: i32, %arg1: i32) -> (i32, i32) {
    %c0_i32 = arith.constant 0 : i32
    %c0_i32_0 = arith.constant 0 : i32
    return %c0_i32, %arg0 : i32, i32
  }
  func.func @transform_2(%arg0: i32, %arg1: i32) -> (i32, i32) {
    %c0_i32 = arith.constant 0 : i32
    return %arg1, %arg0 : i32, i32
  }
  func.func @transform_3(%arg0: i32, %arg1: i32) -> (i32, i32, i32) {
    %c0_i32 = arith.constant 0 : i32
    %c0_i32_0 = arith.constant 0 : i32
    %c0_i32_1 = arith.constant 0 : i32
    return %arg0, %c0_i32, %c0_i32_0 : i32, i32, i32
  }
}

</mosaic_0001>

<bundles_post_ra>
// kernel: tpu_custom_call.1
= control target key start
LH: loop header
LB: loop body
LE: loop exit
PB: predicated region body
PF: predicated region fallthrough
CT: control target
= control target key end

     0   :  { %8 = vsyncpa [#allocation3], 0  ;;  %s738_s0 = inlined_call_operand.hbm [shape: f32[8,384], index: 0, kind: input, shape index: {}]   ;;  %s739_s1 = inlined_call_operand.hbm [shape: f32[8,384], index: 1, kind: input, shape index: {}]   ;;  %s740_s2 = inlined_call_operand.hbm [shape: f32[384,384], index: 2, kind: input, shape index: {}]   ;;  %s741_s3 = inlined_call_operand.vmem [shape: f32[1,8,1], index: 3, kind: output, shape index: {}]  }
   0x1   :  { %9 = vsyncpa [#allocation5], 0  ;;  %s664_s12 = smov [#allocation4]   ;;  %s665_s14 = smov [#allocation2]  }
   0x2   :  { %s26_s13 = sshll.u32 %s664_s12, 4  ;;  %s16_s15 = sshll.u32 %s665_s14, 4  ;;  %s27_s13 = int_to_ptr.vmem [resolvable:$true] %s26_s13  ;;  %s17_s15 = int_to_ptr.vmem [resolvable:$true] %s16_s15 }
   0x3   :  { %s608_s16 = scalar_lea.vmem %s27_s13, 384  ;;  %p613_p1 = scmp.lt.s32.totalorder %s27_s13, %s27_s13 }
   0x4   :  { %p609_p0 = scmp.ne.s32.totalorder %s27_s13, %s608_s16  ;;  %p614_p2 = scmp.lt.s32.totalorder %s608_s16, %s608_s16 }
   0x6   :  { %p615_p3 = por %p614_p2, %p613_p1 }
   0x8   :  { %p616_p4 = pnand %p615_p3, %p609_p0 }
   0xa   :  { %619 = shalt.err (!%p616_p4)
}
   0xb   :  { %29 = dma.hbm_to_vmem [thread:$0]  %s739_s1, 384, %s27_s13, [#allocation5]  }
   0xc   :  { %s628_s19 = scalar_lea.vmem %s17_s15, 384  ;;  %p633_p6 = scmp.lt.s32.totalorder %s17_s15, %s17_s15 }
   0xd   :  { %p629_p5 = scmp.ne.s32.totalorder %s17_s15, %s628_s19  ;;  %p634_p7 = scmp.lt.s32.totalorder %s628_s19, %s628_s19 }
   0xf   :  { %p635_p8 = por %p634_p7, %p633_p6 }
  0x11   :  { %p636_p9 = pnand %p635_p8, %p629_p5 }
  0x13   :  { %639 = shalt.err (!%p636_p9)
}
  0x14   :  { %19 = dma.hbm_to_vmem [thread:$0]  %s738_s0, 384, %s17_s15, [#allocation3]  }
  0x15   :  { %s666_s22 = smov [#allocation6]  }
  0x16   :  { %s35_s23 = sshll.u32 %s666_s22, 4  ;;  %s36_s23 = int_to_ptr.vmem [resolvable:$true] %s35_s23 }
  0x17   :  { %s648_s24 = scalar_lea.vmem %s36_s23, 18432  ;;  %p653_p11 = scmp.lt.s32.totalorder %s36_s23, %s36_s23 }
  0x18   :  { %p649_p10 = scmp.ne.s32.totalorder %s36_s23, %s648_s24  ;;  %p654_p12 = scmp.lt.s32.totalorder %s648_s24, %s648_s24 }
  0x1a   :  { %p655_p13 = por %p654_p12, %p653_p11 }
  0x1c   :  { %p656_p0 = pnand %p655_p13, %p649_p10 }
  0x1e   :  { %659 = shalt.err (!%p656_p0)
}
  0x1f   :  { %s667_s1 = smov 384   ;;  %s668_s25 = smov 24  }
  0x20   :  { %41 = dma.hbm_to_vmem [thread:$0]  %s740_s2, 18432, %s36_s23, [#allocation5], %s667_s1, %s667_s1, %s668_s25  }
  0x21   :  { %660 = dma.done.wait [#allocation3], 384  }
  0x22   :  { %661 = vsyncadd [#allocation3], 4294966912 }
  0x23   :  { %662 = dma.done.wait [#allocation5], 18816  }
  0x24   :  { %663 = vsyncadd [#allocation5], 4294948480  ;;  %v669_v0 = vmov 0.0   ;;  %v103_v1 = vld [vmem:[#allocation6 + $0x170] sm:$0xff]  ;;  %v102_v2 = vld [vmem:[#allocation6 + $0x168] sm:$0xff]  ;;  %vm670_vm0 = vmmov 0  }
  0x25   :  { %342 = vmatprep.mubr.f32.mxu1 %v669_v0  ;;  %v100_v3 = vld [vmem:[#allocation6 + $0x158] sm:$0xff]  ;;  %207 = vmatprep.subr.mxu0 %v103_v1  ;;  %v99_v4 = vld [vmem:[#allocation6 + $0x150] sm:$0xff]  ;;  %v97_v5 = vld [vmem:[#allocation6 + $0x140] sm:$0xff]  ;;  %vm55_vm1 = vcmask 7168  }
  0x26   :  { %208 = vmatpush1.msra.mxu0 %v102_v2  ;;  %v96_v6 = vld [vmem:[#allocation6 + $0x138] sm:$0xff]  ;;  %v94_v7 = vld [vmem:[#allocation6 + $0x128] sm:$0xff]  ;;  %v93_v8 = vld [vmem:[#allocation6 + $0x120] sm:$0xff]  ;;  %56 = vst.msk [vmem:[%s741_s3] sm:$0xff] %vm55_vm1, %v669_v0 }
  0x27   :  { %209 = vmatprep.subr.mxu0 %v100_v3  ;;  %v91_v9 = vld [vmem:[#allocation6 + $0x110] sm:$0xff]  ;;  %v90_v10 = vld [vmem:[#allocation6 + $0x108] sm:$0xff]  ;;  %v88_v11 = vld [vmem:[#allocation6 + $0xf8] sm:$0xff] }
  0x28   :  { %210 = vmatpush1.msra.mxu0 %v99_v4  ;;  %v87_v12 = vld [vmem:[#allocation6 + $0xf0] sm:$0xff]  ;;  %v198_v14 = vld [vmem:[#allocation6 + $0x468] sm:$0xff]  ;;  %v85_v15 = vld [vmem:[#allocation6 + $0xe0] sm:$0xff] }
  0x29   :  { %211 = vmatprep.subr.mxu0 %v97_v5  ;;  %v199_v13 = vld [vmem:[#allocation6 + $0x470] sm:$0xff]  ;;  %v196_v16 = vld [vmem:[#allocation6 + $0x458] sm:$0xff]  ;;  %v193_v19 = vld [vmem:[#allocation6 + $0x440] sm:$0xff] }
  0x2a   :  { %212 = vmatpush1.msra.mxu0 %v96_v6  ;;  %278 = vmatprep.subr.mxu1 %v199_v13  ;;  %v84_v17 = vld [vmem:[#allocation6 + $0xd8] sm:$0xff]  ;;  %v195_v18 = vld [vmem:[#allocation6 + $0x450] sm:$0xff]  ;;  %v82_v20 = vld [vmem:[#allocation6 + $0xc8] sm:$0xff] }
  0x2b   :  { %213 = vmatprep.subr.mxu0 %v94_v7  ;;  %279 = vmatpush1.msra.mxu1 %v198_v14  ;;  %v192_v21 = vld [vmem:[#allocation6 + $0x438] sm:$0xff]  ;;  %v81_v22 = vld [vmem:[#allocation6 + $0xc0] sm:$0xff]  ;;  %v190_v23 = vld [vmem:[#allocation6 + $0x428] sm:$0xff] }
  0x2c   :  { %214 = vmatpush1.msra.mxu0 %v93_v8  ;;  %280 = vmatprep.subr.mxu1 %v196_v16  ;;  %v79_v24 = vld [vmem:[#allocation6 + $0xb0] sm:$0xff]  ;;  %v189_v25 = vld [vmem:[#allocation6 + $0x420] sm:$0xff]  ;;  %v78_v26 = vld [vmem:[#allocation6 + $0xa8] sm:$0xff] }
  0x2d   :  { %215 = vmatprep.subr.mxu0 %v91_v9  ;;  %281 = vmatpush1.msra.mxu1 %v195_v18  ;;  %v187_v27 = vld [vmem:[#allocation6 + $0x410] sm:$0xff]  ;;  %v76_v28 = vld [vmem:[#allocation6 + $0x98] sm:$0xff]  ;;  %v186_v29 = vld [vmem:[#allocation6 + $0x408] sm:$0xff] }
  0x2e   :  { %216 = vmatpush1.msra.mxu0 %v90_v10  ;;  %282 = vmatprep.subr.mxu1 %v193_v19  ;;  %v75_v30 = vld [vmem:[#allocation6 + $0x90] sm:$0xff]  ;;  %v184_v31 = vld [vmem:[#allocation6 + $0x3f8] sm:$0xff]  ;;  %v73_v32 = vld [vmem:[#allocation6 + $0x80] sm:$0xff] }
  0x2f   :  { %217 = vmatprep.subr.mxu0 %v88_v11  ;;  %283 = vmatpush1.msra.mxu1 %v192_v21  ;;  %v183_v33 = vld [vmem:[#allocation6 + $0x3f0] sm:$0xff]  ;;  %v72_v34 = vld [vmem:[#allocation6 + $0x78] sm:$0xff]  ;;  %v181_v35 = vld [vmem:[#allocation6 + $0x3e0] sm:$0xff] }
  0x30   :  { %218 = vmatpush1.msra.mxu0 %v87_v12  ;;  %284 = vmatprep.subr.mxu1 %v190_v23  ;;  %v70_v36 = vld [vmem:[#allocation6 + $0x68] sm:$0xff]  ;;  %v180_v37 = vld [vmem:[#allocation6 + $0x3d8] sm:$0xff]  ;;  %v69_v38 = vld [vmem:[#allocation6 + $0x60] sm:$0xff] }
  0x31   :  { %219 = vmatprep.subr.mxu0 %v85_v15  ;;  %285 = vmatpush1.msra.mxu1 %v189_v25  ;;  %v178_v39 = vld [vmem:[#allocation6 + $0x3c8] sm:$0xff]  ;;  %v67_v40 = vld [vmem:[#allocation6 + $0x50] sm:$0xff]  ;;  %v177_v41 = vld [vmem:[#allocation6 + $0x3c0] sm:$0xff] }
  0x32   :  { %220 = vmatpush1.msra.mxu0 %v84_v17  ;;  %286 = vmatprep.subr.mxu1 %v187_v27  ;;  %v66_v42 = vld [vmem:[#allocation6 + $0x48] sm:$0xff]  ;;  %v175_v43 = vld [vmem:[#allocation6 + $0x3b0] sm:$0xff]  ;;  %v64_v44 = vld [vmem:[#allocation6 + $0x38] sm:$0xff] }
  0x33   :  { %221 = vmatprep.subr.mxu0 %v82_v20  ;;  %287 = vmatpush1.msra.mxu1 %v186_v29  ;;  %v174_v45 = vld [vmem:[#allocation6 + $0x3a8] sm:$0xff]  ;;  %v63_v46 = vld [vmem:[#allocation6 + $0x30] sm:$0xff]  ;;  %v172_v47 = vld [vmem:[#allocation6 + $0x398] sm:$0xff] }
  0x34   :  { %222 = vmatpush1.msra.mxu0 %v81_v22  ;;  %288 = vmatprep.subr.mxu1 %v184_v31  ;;  %v61_v48 = vld [vmem:[#allocation6 + $0x20] sm:$0xff]  ;;  %v171_v49 = vld [vmem:[#allocation6 + $0x390] sm:$0xff]  ;;  %v60_v50 = vld [vmem:[#allocation6 + $0x18] sm:$0xff] }
  0x35   :  { %223 = vmatprep.subr.mxu0 %v79_v24  ;;  %289 = vmatpush1.msra.mxu1 %v183_v33  ;;  %v169_v51 = vld [vmem:[#allocation6 + $0x380] sm:$0xff]  ;;  %v58_v52 = vld [vmem:[#allocation6 + $0x8] sm:$0xff]  ;;  %v168_v53 = vld [vmem:[#allocation6 + $0x378] sm:$0xff] }
  0x36   :  { %224 = vmatpush1.msra.mxu0 %v78_v26  ;;  %290 = vmatprep.subr.mxu1 %v181_v35  ;;  %v57_v54 = vld [vmem:[#allocation6] sm:$0xff]  ;;  %v166_v55 = vld [vmem:[#allocation6 + $0x368] sm:$0xff]  ;;  %v151_v56 = vld [vmem:[#allocation6 + $0x2f0] sm:$0xff] }
  0x37   :  { %225 = vmatprep.subr.mxu0 %v76_v28  ;;  %291 = vmatpush1.msra.mxu1 %v180_v37  ;;  %v165_v57 = vld [vmem:[#allocation6 + $0x360] sm:$0xff]  ;;  %v150_v58 = vld [vmem:[#allocation6 + $0x2e8] sm:$0xff]  ;;  %v163_v59 = vld [vmem:[#allocation6 + $0x350] sm:$0xff] }
  0x38   :  { %226 = vmatpush1.msra.mxu0 %v75_v30  ;;  %292 = vmatprep.subr.mxu1 %v178_v39  ;;  %v148_v60 = vld [vmem:[#allocation6 + $0x2d8] sm:$0xff]  ;;  %v162_v61 = vld [vmem:[#allocation6 + $0x348] sm:$0xff]  ;;  %v147_v62 = vld [vmem:[#allocation6 + $0x2d0] sm:$0xff] }
  0x39   :  { %227 = vmatprep.subr.mxu0 %v73_v32  ;;  %293 = vmatpush1.msra.mxu1 %v177_v41  ;;  %v160_v63 = vld [vmem:[#allocation6 + $0x338] sm:$0xff]  ;;  %v145_v1 = vld [vmem:[#allocation6 + $0x2c0] sm:$0xff]  ;;  %v159_v2 = vld [vmem:[#allocation6 + $0x330] sm:$0xff] }
  0x3a   :  { %228 = vmatpush1.msra.mxu0 %v72_v34  ;;  %294 = vmatprep.subr.mxu1 %v175_v43  ;;  %v144_v3 = vld [vmem:[#allocation6 + $0x2b8] sm:$0xff]  ;;  %v157_v4 = vld [vmem:[#allocation6 + $0x320] sm:$0xff]  ;;  %v142_v5 = vld [vmem:[#allocation6 + $0x2a8] sm:$0xff] }
  0x3b   :  { %229 = vmatprep.subr.mxu0 %v70_v36  ;;  %295 = vmatpush1.msra.mxu1 %v174_v45  ;;  %v156_v6 = vld [vmem:[#allocation6 + $0x318] sm:$0xff]  ;;  %v141_v7 = vld [vmem:[#allocation6 + $0x2a0] sm:$0xff]  ;;  %v154_v8 = vld [vmem:[#allocation6 + $0x308] sm:$0xff] }
  0x3c   :  { %230 = vmatpush1.msra.mxu0 %v69_v38  ;;  %296 = vmatprep.subr.mxu1 %v172_v47  ;;  %v139_v9 = vld [vmem:[#allocation6 + $0x290] sm:$0xff]  ;;  %v153_v10 = vld [vmem:[#allocation6 + $0x300] sm:$0xff]  ;;  %v138_v11 = vld [vmem:[#allocation6 + $0x288] sm:$0xff] }
  0x3d   :  { %231 = vmatprep.subr.mxu0 %v67_v40  ;;  %297 = vmatpush1.msra.mxu1 %v171_v49  ;;  %v152_v12 = vld [vmem:[#allocation6 + $0x2f8] sm:$0xff]  ;;  %v701_v14 = vld [vmem:[#allocation2 + $0x10] sm:$0xff]  ;;  %v135_v15 = vld [vmem:[#allocation6 + $0x270] sm:$0xff] }
  0x3e   :  { %232 = vmatpush1.msra.mxu0 %v66_v42  ;;  %298 = vmatprep.subr.mxu1 %v169_v51  ;;  %v136_v13 = vld [vmem:[#allocation6 + $0x278] sm:$0xff]  ;;  %v133_v17 = vld [vmem:[#allocation6 + $0x260] sm:$0xff]  ;;  %v130_v21 = vld [vmem:[#allocation6 + $0x248] sm:$0xff] }
  0x3f   :  { %233 = vmatprep.subr.mxu0 %v64_v44  ;;  %299 = vmatpush1.msra.mxu1 %v168_v53  ;;  %v104_v16 = vld [vmem:[#allocation6 + $0x178] sm:$0xff]  ;;  %v149_v18 = vld [vmem:[#allocation6 + $0x2e0] sm:$0xff]  ;;  %v146_v22 = vld [vmem:[#allocation6 + $0x2c8] sm:$0xff] }
  0x40   :  { %234 = vmatpush1.msra.mxu0 %v63_v46  ;;  %300 = vmatprep.subr.mxu1 %v166_v55  ;;  %v132_v19 = vld [vmem:[#allocation6 + $0x258] sm:$0xff]  ;;  %v101_v20 = vld [vmem:[#allocation6 + $0x160] sm:$0xff]  ;;  %v127_v25 = vld [vmem:[#allocation6 + $0x230] sm:$0xff] }
  0x41   :  { %235 = vmatprep.subr.mxu0 %v61_v48  ;;  %301 = vmatpush1.msra.mxu1 %v165_v57  ;;  %v129_v23 = vld [vmem:[#allocation6 + $0x240] sm:$0xff]  ;;  %v704_v24 = vld [vmem:[#allocation2 + $0x8] sm:$0xff]  ;;  %v98_v26 = vld [vmem:[#allocation6 + $0x148] sm:$0xff] }
  0x42   :  { %236 = vmatpush1.msra.mxu0 %v60_v50  ;;  %302 = vmatprep.subr.mxu1 %v163_v59  ;;  %v126_v27 = vld [vmem:[#allocation6 + $0x228] sm:$0xff]  ;;  %v143_v28 = vld [vmem:[#allocation6 + $0x2b0] sm:$0xff]  ;;  %v124_v29 = vld [vmem:[#allocation6 + $0x218] sm:$0xff] }
  0x43   :  { %237 = vmatprep.subr.mxu0 %v58_v52  ;;  %303 = vmatpush1.msra.mxu1 %v162_v61  ;;  %v95_v30 = vld [vmem:[#allocation6 + $0x130] sm:$0xff]  ;;  %v140_v32 = vld [vmem:[#allocation6 + $0x298] sm:$0xff]  ;;  %v121_v33 = vld [vmem:[#allocation6 + $0x200] sm:$0xff] }
  0x44   :  { %238 = vmatpush1.msra.mxu0 %v57_v54  ;;  %304 = vmatprep.subr.mxu1 %v160_v63  ;;  %v123_v31 = vld [vmem:[#allocation6 + $0x210] sm:$0xff]  ;;  %v92_v34 = vld [vmem:[#allocation6 + $0x118] sm:$0xff]  ;;  %v137_v36 = vld [vmem:[#allocation6 + $0x280] sm:$0xff] }
  0x45   :  { %239 = vmatprep.subr.mxu0 %v151_v56  ;;  %305 = vmatpush1.msra.mxu1 %v159_v2  ;;  %v120_v35 = vld [vmem:[#allocation6 + $0x1f8] sm:$0xff]  ;;  %v118_v37 = vld [vmem:[#allocation6 + $0x1e8] sm:$0xff]  ;;  %v89_v38 = vld [vmem:[#allocation6 + $0x100] sm:$0xff] }
  0x46   :  { %240 = vmatpush2.msra.mxu0 %v150_v58  ;;  %306 = vmatprep.subr.mxu1 %v157_v4  ;;  %v117_v39 = vld [vmem:[#allocation6 + $0x1e0] sm:$0xff]  ;;  %v134_v40 = vld [vmem:[#allocation6 + $0x268] sm:$0xff]  ;;  %v115_v41 = vld [vmem:[#allocation6 + $0x1d0] sm:$0xff] }
  0x47   :  { %241 = vmatprep.subr.mxu0 %v148_v60  ;;  %307 = vmatpush1.msra.mxu1 %v156_v6  ;;  %v86_v42 = vld [vmem:[#allocation6 + $0xe8] sm:$0xff]  ;;  %v131_v44 = vld [vmem:[#allocation6 + $0x250] sm:$0xff]  ;;  %v112_v45 = vld [vmem:[#allocation6 + $0x1b8] sm:$0xff] }
  0x48   :  { %242 = vmatpush2.msra.mxu0 %v147_v62  ;;  %308 = vmatprep.subr.mxu1 %v154_v8  ;;  %v114_v43 = vld [vmem:[#allocation6 + $0x1c8] sm:$0xff]  ;;  %v83_v46 = vld [vmem:[#allocation6 + $0xd0] sm:$0xff]  ;;  %v128_v48 = vld [vmem:[#allocation6 + $0x238] sm:$0xff] }
  0x49   :  { %243 = vmatprep.subr.mxu0 %v145_v1  ;;  %309 = vmatpush1.msra.mxu1 %v153_v10  ;;  %v111_v47 = vld [vmem:[#allocation6 + $0x1b0] sm:$0xff]  ;;  %v109_v49 = vld [vmem:[#allocation6 + $0x1a0] sm:$0xff]  ;;  %v80_v50 = vld [vmem:[#allocation6 + $0xb8] sm:$0xff] }
  0x4a   :  { %244 = vmatpush2.msra.mxu0 %v144_v3  ;;  %506 = vmatprep.subr.mxu1 %v152_v12  ;;  %v108_v51 = vld [vmem:[#allocation6 + $0x198] sm:$0xff]  ;;  %v125_v52 = vld [vmem:[#allocation6 + $0x220] sm:$0xff]  ;;  %v106_v53 = vld [vmem:[#allocation6 + $0x188] sm:$0xff] }
  0x4b   :  { %245 = vmatprep.subr.mxu0 %v142_v5  ;;  %343 = vmatmul.mubr.f32.vlgmr.msra.gmra.mxu1 %v701_v14  ;;  %v77_v54 = vld [vmem:[#allocation6 + $0xa0] sm:$0xff]  ;;  %v122_v56 = vld [vmem:[#allocation6 + $0x208] sm:$0xff]  ;;  %v201_v57 = vld [vmem:[#allocation2] sm:$0xff] }
  0x4c   :  { %246 = vmatpush2.msra.mxu0 %v141_v7  ;;  %507 = vmatpush3.msra.mxu1 %v104_v16  ;;  %v105_v55 = vld [vmem:[#allocation6 + $0x180] sm:$0xff]  ;;  %v200_v58 = vld [vmem:[#allocation6 + $0x478] sm:$0xff]  ;;  %v74_v59 = vld [vmem:[#allocation6 + $0x88] sm:$0xff] }
  0x4d   :  { %247 = vmatprep.subr.mxu0 %v139_v9  ;;  %508 = vmatprep.subr.mxu1 %v149_v18  ;;  %v119_v60 = vld [vmem:[#allocation6 + $0x1f0] sm:$0xff]  ;;  %v197_v61 = vld [vmem:[#allocation6 + $0x460] sm:$0xff]  ;;  %v116_v63 = vld [vmem:[#allocation6 + $0x1d8] sm:$0xff] }
  0x4e   :  { %248 = vmatpush2.msra.mxu0 %v138_v11  ;;  %509 = vmatpush3.msra.mxu1 %v101_v20  ;;  %v71_v62 = vld [vmem:[#allocation6 + $0x70] sm:$0xff]  ;;  %v194_v1 = vld [vmem:[#allocation6 + $0x448] sm:$0xff]  ;;  %v68_v2 = vld [vmem:[#allocation6 + $0x58] sm:$0xff] }
  0x4f   :  { %249 = vmatprep.subr.mxu0 %v136_v13  ;;  %510 = vmatprep.subr.mxu1 %v146_v22  ;;  %v113_v3 = vld [vmem:[#allocation6 + $0x1c0] sm:$0xff]  ;;  %v191_v4 = vld [vmem:[#allocation6 + $0x430] sm:$0xff]  ;;  %v110_v6 = vld [vmem:[#allocation6 + $0x1a8] sm:$0xff] }
  0x50   :  { %250 = vmatpush2.msra.mxu0 %v135_v15  ;;  %271 = vmatprep.mubr.f32.mxu0 %v704_v24  ;;  %v65_v5 = vld [vmem:[#allocation6 + $0x40] sm:$0xff]  ;;  %v188_v7 = vld [vmem:[#allocation6 + $0x418] sm:$0xff]  ;;  %v62_v8 = vld [vmem:[#allocation6 + $0x28] sm:$0xff] }
  0x51   :  { %251 = vmatprep.subr.mxu0 %v133_v17  ;;  %511 = vmatpush3.msra.mxu1 %v98_v26  ;;  %v107_v9 = vld [vmem:[#allocation6 + $0x190] sm:$0xff]  ;;  %v185_v10 = vld [vmem:[#allocation6 + $0x400] sm:$0xff]  ;;  %v182_v12 = vld [vmem:[#allocation6 + $0x3e8] sm:$0xff] }
  0x52   :  { %252 = vmatpush2.msra.mxu0 %v132_v19  ;;  %512 = vmatprep.subr.mxu1 %v143_v28  ;;  %v59_v11 = vld [vmem:[#allocation6 + $0x10] sm:$0xff]  ;;  %v176_v15 = vld [vmem:[#allocation6 + $0x3b8] sm:$0xff]  ;;  %v173_v16 = vld [vmem:[#allocation6 + $0x3a0] sm:$0xff] }
  0x53   :  { %253 = vmatprep.subr.mxu0 %v130_v21  ;;  %513 = vmatpush3.msra.mxu1 %v95_v30  ;;  %v179_v13 = vld [vmem:[#allocation6 + $0x3d0] sm:$0xff]  ;;  %v170_v17 = vld [vmem:[#allocation6 + $0x388] sm:$0xff]  ;;  %v164_v19 = vld [vmem:[#allocation6 + $0x358] sm:$0xff] }
  0x54   :  { %254 = vmatpush2.msra.mxu0 %v129_v23  ;;  %514 = vmatprep.subr.mxu1 %v140_v32  ;;  %v167_v18 = vld [vmem:[#allocation6 + $0x370] sm:$0xff]  ;;  %v161_v20 = vld [vmem:[#allocation6 + $0x340] sm:$0xff]  ;;  %v158_v21 = vld [vmem:[#allocation6 + $0x328] sm:$0xff] }
  0x55   :  { %255 = vmatprep.subr.mxu0 %v127_v25  ;;  %515 = vmatpush3.msra.mxu1 %v92_v34  ;;  %v155_v22 = vld [vmem:[#allocation6 + $0x310] sm:$0xff]  ;;  %v204_v32 = vld [vmem:[#allocation4] sm:$0xff] }
  0x56   :  { %256 = vmatpush2.msra.mxu0 %v126_v27  ;;  %516 = vmatprep.subr.mxu1 %v137_v36 }
  0x57   :  { %257 = vmatprep.subr.mxu0 %v124_v29  ;;  %517 = vmatpush3.msra.mxu1 %v89_v38  ;;  %v205_v29 = vld [vmem:[#allocation4 + $0x8] sm:$0xff] }
  0x58   :  { %258 = vmatpush2.msra.mxu0 %v123_v31  ;;  %518 = vmatprep.subr.mxu1 %v134_v40 }
  0x59   :  { %259 = vmatprep.subr.mxu0 %v121_v33  ;;  %519 = vmatpush3.msra.mxu1 %v86_v42 }
  0x5a   :  { %260 = vmatpush2.msra.mxu0 %v120_v35  ;;  %520 = vmatprep.subr.mxu1 %v131_v44  ;;  %v206_v35 = vld [vmem:[#allocation4 + $0x10] sm:$0xff] }
  0x5b   :  { %261 = vmatprep.subr.mxu0 %v118_v37  ;;  %521 = vmatpush3.msra.mxu1 %v83_v46 }
  0x5c   :  { %262 = vmatpush2.msra.mxu0 %v117_v39  ;;  %522 = vmatprep.subr.mxu1 %v128_v48 }
  0x5d   :  { %263 = vmatprep.subr.mxu0 %v115_v41  ;;  %523 = vmatpush3.msra.mxu1 %v80_v50  ;;  %v489_v41 = vld [vmem:[%s741_s3] sm:$0xff] }
  0x5e   :  { %264 = vmatpush2.msra.mxu0 %v114_v43  ;;  %524 = vmatprep.subr.mxu1 %v125_v52 }
  0x5f   :  { %265 = vmatprep.subr.mxu0 %v112_v45  ;;  %525 = vmatpush3.msra.mxu1 %v77_v54 }
  0x60   :  { %266 = vmatpush2.msra.mxu0 %v111_v47  ;;  %526 = vmatprep.subr.mxu1 %v122_v56 }
  0x61   :  { %267 = vmatprep.subr.mxu0 %v109_v49  ;;  %527 = vmatpush3.msra.mxu1 %v74_v59 }
  0x62   :  { %268 = vmatpush2.msra.mxu0 %v108_v51  ;;  %528 = vmatprep.subr.mxu1 %v119_v60 }
  0x63   :  { %269 = vmatprep.subr.mxu0 %v106_v53  ;;  %529 = vmatpush3.msra.mxu1 %v71_v62 }
  0x64   :  { %270 = vmatpush2.msra.mxu0 %v105_v55  ;;  %530 = vmatprep.subr.mxu1 %v116_v63 }
  0x65   :  { %272 = vmatmul.mubr.f32.vlgmr.msra.gmra.mxu0 %v201_v57  ;;  %558 = vmatprep.subr.mxu0 %v669_v0 }
  0x66   :  { %559 = vmatpush3.msra.mxu0 %v200_v58  ;;  %531 = vmatpush3.msra.mxu1 %v68_v2 }
  0x67   :  { %560 = vmatprep.subr.mxu0 %v669_v0  ;;  %532 = vmatprep.subr.mxu1 %v113_v3 }
  0x68   :  { %561 = vmatpush3.msra.mxu0 %v197_v61  ;;  %533 = vmatpush3.msra.mxu1 %v65_v5 }
  0x69   :  { %562 = vmatprep.subr.mxu0 %v669_v0  ;;  %534 = vmatprep.subr.mxu1 %v110_v6 }
  0x6a   :  { %563 = vmatpush3.msra.mxu0 %v194_v1  ;;  %535 = vmatpush3.msra.mxu1 %v62_v8 }
  0x6b   :  { %564 = vmatprep.subr.mxu0 %v669_v0  ;;  %536 = vmatprep.subr.mxu1 %v107_v9 }
  0x6c   :  { %565 = vmatpush3.msra.mxu0 %v191_v4  ;;  %537 = vmatpush3.msra.mxu1 %v59_v11 }
  0x6d   :  { %566 = vmatprep.subr.mxu0 %v669_v0  ;;  %413 = vmatprep.mubr.f32.mxu1 %v704_v24 }
  0x6e   :  { %567 = vmatpush3.msra.mxu0 %v188_v7  ;;  %414 = vmatmul.mubr.f32.vlgmr.msra.gmra.mxu1 %v201_v57 }
  0x6f   :  { %568 = vmatprep.subr.mxu0 %v669_v0  ;;  %590 = vmatprep.mubr.msk.f32.mxu0 %vm670_vm0, %v669_v0 }
  0x70   :  { %569 = vmatpush3.msra.mxu0 %v185_v10 }
  0x71   :  { %570 = vmatprep.subr.mxu0 %v669_v0 }
  0x72   :  { %571 = vmatpush3.msra.mxu0 %v182_v12 }
  0x73   :  { %572 = vmatprep.subr.mxu0 %v669_v0 }
  0x74   :  { %573 = vmatpush3.msra.mxu0 %v179_v13 }
  0x75   :  { %574 = vmatprep.subr.mxu0 %v669_v0 }
  0x76   :  { %575 = vmatpush3.msra.mxu0 %v176_v15 }
  0x77   :  { %576 = vmatprep.subr.mxu0 %v669_v0 }
  0x78   :  { %577 = vmatpush3.msra.mxu0 %v173_v16 }
  0x79   :  { %578 = vmatprep.subr.mxu0 %v669_v0 }
  0x7a   :  { %579 = vmatpush3.msra.mxu0 %v170_v17 }
  0x7b   :  { %580 = vmatprep.subr.mxu0 %v669_v0 }
  0x7c   :  { %581 = vmatpush3.msra.mxu0 %v167_v18 }
  0x7d   :  { %582 = vmatprep.subr.mxu0 %v669_v0 }
  0x7e   :  { %583 = vmatpush3.msra.mxu0 %v164_v19 }
  0x7f   :  { %584 = vmatprep.subr.mxu0 %v669_v0 }
  0x80   :  { %585 = vmatpush3.msra.mxu0 %v161_v20 }
  0x81   :  { %586 = vmatprep.subr.mxu0 %v669_v0 }
  0x82   :  { %587 = vmatpush3.msra.mxu0 %v158_v21 }
  0x83   :  { %588 = vmatprep.subr.mxu0 %v669_v0 }
  0x84   :  { %589 = vmatpush3.msra.mxu0 %v155_v22 }
  0x85   :  { %591 = vmatmul.mubr.f32.vlgmr.msra.gmra.mxu0 %v701_v14 }
 0x10b   :  { %v344_v23 = vpop.f32.mrf.mxu1 }
 0x10d   :  { %v346_v25 = vpop.f32.mrf.mxu1 }
 0x125   :  { %v273_v24 = vpop.f32.mrf.mxu0 }
 0x126   :  { %v345_v31 = vadd.f32 %v344_v23, %v273_v24 }
 0x127   :  { %v275_v26 = vpop.f32.mrf.mxu0 }
 0x128   :  { %v347_v28 = vadd.f32 %v346_v25, %v275_v26  ;;  %v490_v36 = vmul.f32 %v345_v31, %v204_v32 }
 0x12a   :  { %v491_v33 = vmul.f32 %v347_v28, %v205_v29 }
 0x12c   :  { %v493_v40 = vadd.f32 %v491_v33, %v490_v36 }
 0x12e   :  { %v538_v27 = vpop.f32.mrf.mxu1 }
 0x130   :  { %v539_v30 = vpop.f32.mrf.mxu1 }
 0x131   :  { %v540_v34 = vadd.f32 %v539_v30, %v538_v27 }
 0x145   :  { %v485_v14 = vpop.f32.mrf.mxu0 }
 0x146   :  { %v486_v37 = vadd.f32 %v540_v34, %v485_v14 }
 0x147   :  { %v592_v38 = vpop.f32.mrf.mxu0 }
 0x148   :  { %v492_v39 = vmul.f32 %v486_v37, %v206_v35 }
 0x14a   :  { %v494_v0 = vadd.f32 %v493_v40, %v492_v39 }
 0x14c   :  { %495 = vadd.xlane.f32.xlu0 %v494_v0 }
 0x1d5   :  { %v496_v42 = vpop.xlane.xlu0 %495 }
 0x1d6   :  { %v497_v43 = vadd.f32 %v496_v42, %v489_v41 }
 0x1d8   :  { %499 = vst.msk [vmem:[%s741_s3] sm:$0xff] %vm55_vm1, %v497_v43 }
 0x1d9   :  { %504 = vsyncpa [#allocation3], 1 }
 0x1da   :  { %505 = vsyncpa [#allocation5], 1 }

</bundles_post_ra>
